<compile_context>
chip_gen: v7x
topology: tpu7x:2x2x1
jax: 0.10.0
libtpu: 0.0.40
codegen_flags: <defaults>
</compile_context>

<pallas_src>
import jax
import jax.numpy as jnp
from jax.experimental import pallas as pl
from jax.experimental.pallas import tpu as pltpu


def _round_up(x, m):
    return ((x + m - 1) // m) * m


# ----------------------------------------------------------------------------
# Parameter prep: split w1, fold gather (+b1) and scale, pack into one slab.
# ----------------------------------------------------------------------------
def prepare_params(params, X_tensor, output_dim, scale):
    """One-time parameter prep (call once, outside the solver loop).

    - Splits w1 into its y-part (w1y) and x-part (w1x)  -> concat-free layer 1.
    - Pre-folds the row gather into layer 1: XW = X @ w1x + b1. Exact because
      the clamped one-hot gather row always sums to exactly 1.
    - Folds `scale` into the last Linear (w3, b3).
    - Packs everything into ONE contiguous f32 slab (8-row-aligned sections)
      so the kernel needs a single resident VMEM input.

    Returns (slab, layout) where layout holds the static row offsets.
    """
    w1, b1, w2, b2, w3, b3 = params          # w: (in, out), b: (1, out)
    H = w2.shape[0]
    T = X_tensor.shape[0]
    Dy = output_dim
    assert Dy <= H, "packing assumes output_dim <= hidden_dim"

    w1y = w1[:Dy]                                         # y rows come first in concat
    w1x = w1[Dy:]
    XW = X_tensor.astype(jnp.float32) @ w1x + b1          # (T, H): gather + b1 folded
    w3s = w3 * scale                                      # (H, Dy)
    b3s = b3 * scale                                      # (1, Dy)

    r_w1y = _round_up(T, 8)
    r_w2 = r_w1y + _round_up(Dy, 8)
    r_b2 = r_w2 + _round_up(H, 8)
    r_w3 = r_b2 + 8
    r_b3 = r_w3 + _round_up(H, 8)
    n_rows = r_b3 + 8

    slab = jnp.zeros((n_rows, H), jnp.float32)
    slab = slab.at[:T].set(XW)
    slab = slab.at[r_w1y:r_w1y + Dy].set(w1y)
    slab = slab.at[r_w2:r_w2 + H].set(w2)
    slab = slab.at[r_b2:r_b2 + 1].set(b2)
    slab = slab.at[r_w3:r_w3 + H, :Dy].set(w3s)
    slab = slab.at[r_b3:r_b3 + 1, :Dy].set(b3s)

    layout = dict(T=T, Dy=Dy, H=H, r_w1y=r_w1y, r_w2=r_w2, r_b2=r_b2,
                  r_w3=r_w3, r_b3=r_b3)
    return slab, layout


# ----------------------------------------------------------------------------
# In-kernel RHS math (shared by both kernels).
# ----------------------------------------------------------------------------
def _rhs_from_slab(y, idx, slab_ref, lay):
    """dy/dt for one batch tile; `idx` is the already-clamped (tile_b, 1) row id."""
    T, Dy, H = lay["T"], lay["Dy"], lay["H"]
    tile_b = y.shape[0]

    # Gather realized as one-hot(idx) @ XW on the MXU (XW = X @ w1x + b1).
    col = jax.lax.broadcasted_iota(jnp.int32, (tile_b, T), 1)
    onehot = (col == idx).astype(jnp.float32)
    hx = jnp.dot(onehot, slab_ref[0:T, :], preferred_element_type=jnp.float32)
    hy = jnp.dot(y, slab_ref[lay["r_w1y"]:lay["r_w1y"] + Dy, :],
                 preferred_element_type=jnp.float32)
    h1 = jnp.tanh(hx + hy)
    h2 = jnp.tanh(jnp.dot(h1, slab_ref[lay["r_w2"]:lay["r_w2"] + H, :],
                          preferred_element_type=jnp.float32)
                  + slab_ref[lay["r_b2"]:lay["r_b2"] + 1, :])
    # scale already folded into w3 / b3.
    return (jnp.dot(h2, slab_ref[lay["r_w3"]:lay["r_w3"] + H, :Dy],
                    preferred_element_type=jnp.float32)
            + slab_ref[lay["r_b3"]:lay["r_b3"] + 1, :Dy])


def _make_rhs_kernel(layout):
    T = layout["T"]

    def kernel(offset_ref, base_idx_ref, y_ref, slab_ref, out_ref):
        idx = jnp.clip(base_idx_ref[...] + offset_ref[0], 0, T - 1)
        out_ref[...] = _rhs_from_slab(y_ref[...], idx, slab_ref, layout)

    return kernel


def _make_euler_kernel(layout, dt):
    T = layout["T"]

    def kernel(offsets_ref, base_idx_ref, y0_ref, slab_ref, y_ref):
        k = pl.program_id(1)

        @pl.when(k == 0)
        def _():
            y_ref[...] = y0_ref[...]          # state carried in the output block

        idx = jnp.clip(base_idx_ref[...] + offsets_ref[k], 0, T - 1)
        y = y_ref[...]
        y_ref[...] = y + dt * _rhs_from_slab(y, idx, slab_ref, layout)

    return kernel


# ----------------------------------------------------------------------------
# Wrappers.
# ----------------------------------------------------------------------------
def _pad_batch(y, base_idx, batch, padded_b):
    # NOTE: callers in a tight solver loop should pre-pad once / pick a batch
    # that's a tile multiple to avoid this per-call copy; padded rows gather
    # X row 0 and are sliced off, so they are harmless.
    idx = base_idx.astype(jnp.int32).reshape(batch, 1)
    if padded_b == batch:
        return y, idx
    y_in = jnp.zeros((padded_b, y.shape[1]), y.dtype).at[:batch].set(y)
    idx_in = jnp.zeros((padded_b, 1), jnp.int32).at[:batch].set(idx)
    return y_in, idx_in


def heat_ode_func(t, y, base_idx, slab, layout, *, delta_t=900.0, tile_b=128):
    """Single RHS evaluation — exact HeatODEFunc.forward(t, y, base_idx)."""
    batch, Dy = y.shape
    assert Dy == layout["Dy"]
    offset = jnp.floor(jnp.asarray(t, jnp.float32) / delta_t).astype(jnp.int32).reshape(1)

    tile_b = min(tile_b, _round_up(batch, 8))
    padded_b = _round_up(batch, tile_b)
    y_in, idx_in = _pad_batch(y, base_idx, batch, padded_b)

    out = pl.pallas_call(
        _make_rhs_kernel(layout),
        out_shape=jax.ShapeDtypeStruct((padded_b, Dy), jnp.float32),
        grid_spec=pltpu.PrefetchScalarGridSpec(
            num_scalar_prefetch=1,
            grid=(padded_b // tile_b,),
            in_specs=[
                pl.BlockSpec((tile_b, 1), lambda i, off: (i, 0)),     # base_idx
                pl.BlockSpec((tile_b, Dy), lambda i, off: (i, 0)),    # y
                pl.BlockSpec(slab.shape, lambda i, off: (0, 0)),      # packed params
            ],
            out_specs=pl.BlockSpec((tile_b, Dy), lambda i, off: (i, 0)),
        ),
        compiler_params=pltpu.CompilerParams(dimension_semantics=("parallel",)),
    )(offset, idx_in, y_in, slab)
    return out[:batch] if padded_b != batch else out


def heat_ode_integrate_euler(t0, dt, n_steps, y0, base_idx, slab, layout, *,
                             delta_t=900.0, tile_b=128):
    """n_steps forward-Euler updates  y <- y + dt * f(t_k, y)  fused into ONE
    pallas_call. Time is a trailing 'arbitrary' grid axis; the offset schedule
    arrives via scalar prefetch; weights stay resident; state lives in the
    output block (index constant along the time axis)."""
    batch, Dy = y0.shape
    assert Dy == layout["Dy"]
    ts = jnp.asarray(t0, jnp.float32) + jnp.asarray(dt, jnp.float32) * jnp.arange(
        n_steps, dtype=jnp.float32)
    offsets = jnp.floor(ts / delta_t).astype(jnp.int32)           # (n_steps,)

    tile_b = min(tile_b, _round_up(batch, 8))
    padded_b = _round_up(batch, tile_b)
    y_in, idx_in = _pad_batch(y0, base_idx, batch, padded_b)

    out = pl.pallas_call(
        _make_euler_kernel(layout, float(dt)),
        out_shape=jax.ShapeDtypeStruct((padded_b, Dy), jnp.float32),
        grid_spec=pltpu.PrefetchScalarGridSpec(
            num_scalar_prefetch=1,
            grid=(padded_b // tile_b, n_steps),
            in_specs=[
                pl.BlockSpec((tile_b, 1), lambda i, k, offs: (i, 0)),   # base_idx
                pl.BlockSpec((tile_b, Dy), lambda i, k, offs: (i, 0)),  # y0
                pl.BlockSpec(slab.shape, lambda i, k, offs: (0, 0)),    # packed params
            ],
            out_specs=pl.BlockSpec((tile_b, Dy), lambda i, k, offs: (i, 0)),
        ),
        compiler_params=pltpu.CompilerParams(
            dimension_semantics=("parallel", "arbitrary")),
    )(offsets, idx_in, y_in, slab)
    return out[:batch] if padded_b != batch else out


# ----------------------------------------------------------------------------
# Synthetic params + pure-JAX references.
# ----------------------------------------------------------------------------
def init_params(key, input_dim, hidden_dim, output_dim):
    """Deterministic synthetic parameters. Weights stored as (in, out)."""
    in0 = input_dim + output_dim
    ks = jax.random.split(key, 6)

    def lin(kw, kb, fan_in, fan_out):
        bound = 1.0 / jnp.sqrt(fan_in)
        w = jax.random.uniform(kw, (fan_in, fan_out), jnp.float32, -bound, bound)
        b = jax.random.uniform(kb, (1, fan_out), jnp.float32, -bound, bound)
        return w, b

    w1, b1 = lin(ks[0], ks[1], in0, hidden_dim)
    w2, b2 = lin(ks[2], ks[3], hidden_dim, hidden_dim)
    w3, b3 = lin(ks[4], ks[5], hidden_dim, output_dim)
    return (w1, b1, w2, b2, w3, b3)


def _reference_rhs(t, y, base_idx, X_tensor, params, delta_t, scale):
    """Pure-JAX reference mirroring the PyTorch forward (un-prepped params)."""
    w1, b1, w2, b2, w3, b3 = params
    offset = jnp.floor(jnp.asarray(t, jnp.float32) / delta_t).astype(jnp.int32)
    idx = jnp.clip(base_idx + offset, 0, X_tensor.shape[0] - 1)
    x_t = X_tensor[idx]
    inp = jnp.concatenate([y, x_t], axis=1)
    h1 = jnp.tanh(inp @ w1 + b1)
    h2 = jnp.tanh(h1 @ w2 + b2)
    return (h2 @ w3 + b3) * scale


if __name__ == "__main__":
    # Small shapes consistent with the module.
    batch = 8
    input_dim = 6
    output_dim = 4
    hidden_dim = 32
    T = 64            # rows in X_tensor
    delta_t = 900.0
    scale = 0.01

    key = jax.random.PRNGKey(0)
    k_x, k_y, k_idx, k_p = jax.random.split(key, 4)

    X_tensor = jax.random.normal(k_x, (T, input_dim), jnp.float32)
    y = jax.random.normal(k_y, (batch, output_dim), jnp.float32)
    base_idx = jax.random.randint(k_idx, (batch,), 0, T, jnp.int32)
    t = jnp.float32(2000.0)   # -> offset = 2
    params = init_params(k_p, input_dim, hidden_dim, output_dim)

    # One-time prep: split w1, fold gather (+b1) and scale, pack one slab.
    slab, layout = prepare_params(params, X_tensor, output_dim, scale)

    # 1) Single RHS evaluation — exact PyTorch forward semantics.
    out = heat_ode_func(t, y, base_idx, slab, layout, delta_t=delta_t)
    out = jax.block_until_ready(out)
    ref = _reference_rhs(t, y, base_idx, X_tensor, params, delta_t, scale)
    assert out.shape == (batch, output_dim)
    assert jnp.allclose(out, ref, atol=1e-5, rtol=1e-5)

    # 2) Fused integration: 16 Euler steps (16 RHS evals) in ONE pallas_call.
    n_steps = 16
    dt = 100.0
    t0 = 500.0
    y_final = heat_ode_integrate_euler(t0, dt, n_steps, y, base_idx, slab, layout,
                                       delta_t=delta_t)
    y_final = jax.block_until_ready(y_final)

    y_ref = y
    for k in range(n_steps):
        tk = t0 + k * dt
        y_ref = y_ref + dt * _reference_rhs(tk, y_ref, base_idx, X_tensor,
                                            params, delta_t, scale)
    assert y_final.shape == (batch, output_dim)
    assert jnp.allclose(y_final, y_ref, atol=1e-3, rtol=1e-3)

    print("KERNEL_OK")
</pallas_src>

<mosaic_0001>
module attributes {stable_mosaic.version = 11 : i64} {
  func.func @kernel(%arg0: i32, %arg1: memref<1xi32, #tpu.memory_space<smem>>, %arg2: memref<8x1xi32, #tpu.memory_space<vmem>>, %arg3: memref<8x4xf32, #tpu.memory_space<vmem>>, %arg4: memref<152x32xf32, #tpu.memory_space<vmem>>, %arg5: memref<8x4xf32, #tpu.memory_space<vmem>>) attributes {dimension_semantics = [#tpu.dimension_semantics<parallel>], iteration_bounds = array<i64: 1>, scalar_prefetch = 1 : i64, scratch_operands = 0 : i64, tpu.core_type = #tpu.core_type<tc>, window_params = [{transform_indices = @transform_0, window_bounds = array<i64: 8, 1>}, {transform_indices = @transform_1, window_bounds = array<i64: 8, 4>}, {pipeline_mode = #tpu.pipeline_mode<synchronous>, transform_indices = @transform_2, window_bounds = array<i64: 152, 32>}, {transform_indices = @transform_3, window_bounds = array<i64: 8, 4>}]} {
    %c0 = arith.constant 0 : index
    %c0_0 = arith.constant 0 : index
    %0 = vector.load %arg2[%c0, %c0_0] : memref<8x1xi32, #tpu.memory_space<vmem>>, vector<8x1xi32>
    %c0_1 = arith.constant 0 : index
    %1 = memref.load %arg1[%c0_1] : memref<1xi32, #tpu.memory_space<smem>>
    %2 = vector.broadcast %1 : i32 to vector<8x1xi32>
    %3 = arith.addi %0, %2 : vector<8x1xi32>
    %c0_i32 = arith.constant 0 : i32
    %c63_i32 = arith.constant 63 : i32
    %4 = vector.broadcast %c0_i32 : i32 to vector<8x1xi32>
    %5 = arith.maxsi %4, %3 : vector<8x1xi32>
    %6 = vector.broadcast %c63_i32 : i32 to vector<8x1xi32>
    %7 = arith.minsi %6, %5 : vector<8x1xi32>
    %c0_2 = arith.constant 0 : index
    %c0_3 = arith.constant 0 : index
    %8 = vector.load %arg3[%c0_2, %c0_3] : memref<8x4xf32, #tpu.memory_space<vmem>>, vector<8x4xf32>
    %9 = tpu.iota {dimensions = array<i32: 1>} : vector<8x64xi32>
    %10 = vector.broadcast %7 : vector<8x1xi32> to vector<8x64xi32>
    %11 = arith.cmpi eq, %9, %10 : vector<8x64xi32>
    %12 = arith.extui %11 : vector<8x64xi1> to vector<8x64xi32>
    %13 = arith.sitofp %12 : vector<8x64xi32> to vector<8x64xf32>
    %c0_4 = arith.constant 0 : index
    %c0_5 = arith.constant 0 : index
    %14 = vector.load %arg4[%c0_4, %c0_5] : memref<152x32xf32, #tpu.memory_space<vmem>>, vector<64x32xf32>
    %cst = arith.constant dense<0.000000e+00> : vector<8x32xf32>
    %15 = tpu.matmul %13, %14, %cst {dimension_numbers = #tpu.dot_dimension_numbers<[1], [0], [0], [1], [0, 0, 1, 1], [], []>} : vector<8x64xf32>, vector<64x32xf32>, vector<8x32xf32> -> vector<8x32xf32>
    %c64 = arith.constant 64 : index
    %c0_6 = arith.constant 0 : index
    %16 = vector.load %arg4[%c64, %c0_6] : memref<152x32xf32, #tpu.memory_space<vmem>>, vector<4x32xf32>
    %cst_7 = arith.constant dense<0.000000e+00> : vector<8x32xf32>
    %17 = tpu.matmul %8, %16, %cst_7 {dimension_numbers = #tpu.dot_dimension_numbers<[1], [0], [0], [1], [0, 0, 1, 1], [], []>} : vector<8x4xf32>, vector<4x32xf32>, vector<8x32xf32> -> vector<8x32xf32>
    %18 = arith.addf %15, %17 : vector<8x32xf32>
    %19 = math.tanh %18 : vector<8x32xf32>
    %c72 = arith.constant 72 : index
    %c0_8 = arith.constant 0 : index
    %20 = vector.load %arg4[%c72, %c0_8] : memref<152x32xf32, #tpu.memory_space<vmem>>, vector<32x32xf32>
    %cst_9 = arith.constant dense<0.000000e+00> : vector<8x32xf32>
    %21 = tpu.matmul %19, %20, %cst_9 {dimension_numbers = #tpu.dot_dimension_numbers<[1], [0], [0], [1], [0, 0, 1, 1], [], []>} : vector<8x32xf32>, vector<32x32xf32>, vector<8x32xf32> -> vector<8x32xf32>
    %c104 = arith.constant 104 : index
    %c0_10 = arith.constant 0 : index
    %22 = vector.load %arg4[%c104, %c0_10] : memref<152x32xf32, #tpu.memory_space<vmem>>, vector<1x32xf32>
    %23 = vector.broadcast %22 : vector<1x32xf32> to vector<8x32xf32>
    %24 = arith.addf %21, %23 : vector<8x32xf32>
    %25 = math.tanh %24 : vector<8x32xf32>
    %c112 = arith.constant 112 : index
    %c0_11 = arith.constant 0 : index
    %26 = vector.load %arg4[%c112, %c0_11] : memref<152x32xf32, #tpu.memory_space<vmem>>, vector<32x4xf32>
    %cst_12 = arith.constant dense<0.000000e+00> : vector<8x4xf32>
    %27 = tpu.matmul %25, %26, %cst_12 {dimension_numbers = #tpu.dot_dimension_numbers<[1], [0], [0], [1], [0, 0, 1, 1], [], []>} : vector<8x32xf32>, vector<32x4xf32>, vector<8x4xf32> -> vector<8x4xf32>
    %c144 = arith.constant 144 : index
    %c0_13 = arith.constant 0 : index
    %28 = vector.load %arg4[%c144, %c0_13] : memref<152x32xf32, #tpu.memory_space<vmem>>, vector<1x4xf32>
    %29 = vector.broadcast %28 : vector<1x4xf32> to vector<8x4xf32>
    %30 = arith.addf %27, %29 : vector<8x4xf32>
    %c0_14 = arith.constant 0 : index
    %c0_15 = arith.constant 0 : index
    %31 = vector.load %arg5[%c0_14, %c0_15] : memref<8x4xf32, #tpu.memory_space<vmem>>, vector<8x4xf32>
    tpu.vector_store %arg5[%c0_14, %c0_15], %30 {strides = array<i32>} : memref<8x4xf32, #tpu.memory_space<vmem>>, vector<8x4xf32>,
    return
  }
  func.func @transform_0(%arg0: i32, %arg1: memref<1xi32, #tpu.memory_space<smem>>) -> (i32, i32) {
    %c0_i32 = arith.constant 0 : i32
    %c0_i32_0 = arith.constant 0 : i32
    return %arg0, %c0_i32 : i32, i32
  }
  func.func @transform_1(%arg0: i32, %arg1: memref<1xi32, #tpu.memory_space<smem>>) -> (i32, i32) {
    %c0_i32 = arith.constant 0 : i32
    %c0_i32_0 = arith.constant 0 : i32
    return %arg0, %c0_i32 : i32, i32
  }
  func.func @transform_2(%arg0: i32, %arg1: memref<1xi32, #tpu.memory_space<smem>>) -> (i32, i32) {
    %c0_i32 = arith.constant 0 : i32
    %c0_i32_0 = arith.constant 0 : i32
    %c0_i32_1 = arith.constant 0 : i32
    return %c0_i32, %c0_i32_0 : i32, i32
  }
  func.func @transform_3(%arg0: i32, %arg1: memref<1xi32, #tpu.memory_space<smem>>) -> (i32, i32) {
    %c0_i32 = arith.constant 0 : i32
    %c0_i32_0 = arith.constant 0 : i32
    return %arg0, %c0_i32 : i32, i32
  }
}

</mosaic_0001>

<bundles_post_ra>
// kernel: tpu_custom_call.1
= control target key start
LH: loop header
LB: loop body
LE: loop exit
PB: predicated region body
PF: predicated region fallthrough
CT: control target
= control target key end

     0   :  { %vm46_vm0 = vcmask 1043456   ;;  %v476_v0 = vmov 0   ;;  %v477_v3 = vmov 0.0   ;;  %vm42_vm1 = vcmask 31744   ;;  %s582_s0 = inlined_call_operand.<no memory space> [shape: s32[1], index: 0, kind: input, shape index: {}]   ;;  %s583_s1 = inlined_call_operand.vmem [shape: s32[8,1], index: 1, kind: input, shape index: {}]   ;;  %s584_s3 = inlined_call_operand.vmem [shape: f32[152,32], index: 3, kind: input, shape index: {}]   ;;  %s585_s2 = inlined_call_operand.vmem [shape: f32[8,4], index: 2, kind: input, shape index: {}]   ;;  %s586_s4 = inlined_call_operand.vmem [shape: f32[8,4], index: 4, kind: output, shape index: {}]  }
   0x1   :  { %471 = vset.pattern.permute.xlu0 %v476_v0  ;;  %v16_v1 = vld [vmem:[%s583_s1] sm:$0xff]  ;;  %v18_v2 = vstv %s582_s0  ;;  %395 = vmatprep.subr.mxu0 %v477_v3  ;;  %vm478_vm2 = vmmov 0   ;;  %v34_v8 = vld [vmem:[%s584_s3 + $0x8] sm:$0xff]  ;;  %v35_v9 = vld [vmem:[%s584_s3 + $0x10] sm:$0xff]  ;;  %v479_v10 = vmov 0.0|0.0   ;;  %v25_v22 = vlaneseq }
   0x2   :  { %v41_v4 = vld [vmem:[%s584_s3 + $0x40] sm:$0xf]  ;;  %v19_v6 = vadd.s32 %v18_v2, %v16_v1  ;;  %397 = vmatprep.mubr.msk.f32.mxu0 %vm478_vm2, %v477_v3  ;;  %v36_v12 = vld [vmem:[%s584_s3 + $0x18] sm:$0xff]  ;;  %453 = vmatprep.subr.bf16.mxu1 %v479_v10  ;;  %v38_v16 = vld [vmem:[%s584_s3 + $0x28] sm:$0xff]  ;;  %vm120_vm5 = vcmask 523264   ;;  %vm204_vm7 = vcmask 261120  }
   0x3   :  { %v24_v5 = vld [vmem:[%s585_s2] sm:$0xff]  ;;  %396 = vmatpush3.msk.msra.mxu0 %vm46_vm0, %v41_v4  ;;  %v445_v14 = vpack.c.bf16 %v36_v12, %v35_v9  ;;  %427 = vmatprep.mubr.msk.f32.mxu1 %vm478_vm2, %v477_v3  ;;  %v39_v19 = vld [vmem:[%s584_s3 + $0x30] sm:$0xff]  ;;  %v40_v20 = vld [vmem:[%s584_s3 + $0x38] sm:$0xff]  ;;  %v26_v23 = vand.u32 127, %v25_v22 }
   0x4   :  { %v33_v7 = vld [vmem:[%s584_s3] sm:$0xff]  ;;  %441 = vmatprep.subr.bf16.mxu0 %v479_v10  ;;  %398 = vmatmul.mubr.msk.f32.vlgmr.msra.gmra.mrb[0].mxu0 %vm42_vm1, %v24_v5  ;;  %vm20_vm3 = vcmp.gt.s32.totalorder %v19_v6, 0  ;;  %v451_v21 = vpack.c.bf16 %v40_v20, %v39_v19  ;;  %v195_v26 = vld [vmem:[%s584_s3 + $0x48] sm:$0xff]  ;;  %v196_v27 = vld [vmem:[%s584_s3 + $0x50] sm:$0xff] }
   0x5   :  { %v442_v11 = vpack.c.bf16 %v34_v8, %v33_v7  ;;  %416 = vmatprep.mubr.msk.f32.mxu0 %vm478_vm2, %v477_v3  ;;  %v21_v13 = vsel %vm20_vm3, %v19_v6, 0  ;;  %v37_v15 = vld [vmem:[%s584_s3 + $0x20] sm:$0xff]  ;;  %v197_v28 = vld [vmem:[%s584_s3 + $0x58] sm:$0xff]  ;;  %v454_v29 = vpack.c.bf16 %v196_v27, %v195_v26  ;;  %v279_v35 = vld [vmem:[%s584_s3 + $0x70] sm:$0xff] }
   0x6   :  { %vm22_vm4 = vcmp.lt.s32.totalorder %v21_v13, 63  ;;  %v448_v18 = vpack.c.bf16 %v38_v16, %v37_v15  ;;  %v198_v30 = vld [vmem:[%s584_s3 + $0x60] sm:$0xff]  ;;  %v280_v36 = vld [vmem:[%s584_s3 + $0x78] sm:$0xff]  ;;  %v282_v39 = vld [vmem:[%s584_s3 + $0x88] sm:$0xff] }
   0x7   :  { %443 = vmatpush3.bf16.msra.mxu0 %v442_v11  ;;  %v23_v17 = vsel %vm22_vm4, %v21_v13, 63  ;;  %455 = vmatpush3.bf16.msra.mxu1 %v454_v29  ;;  %v457_v31 = vpack.c.bf16 %v198_v30, %v197_v28  ;;  %v281_v37 = vld [vmem:[%s584_s3 + $0x80] sm:$0xff]  ;;  %v460_v38 = vpack.c.bf16 %v280_v36, %v279_v35  ;;  %v370_v41 = vld [vmem:[%s584_s3 + $0x68] ss:$0 sm:$0xff]  ;;  %v372_v46 = vld [vmem:[%s584_s3 + $0x90] ss:$0 sm:$0xff] }
   0x8   :  { %444 = vmatprep.subr.bf16.mxu0 %v479_v10  ;;  %28 = vperm.xlu0 %471, %v23_v17   ;;  %v463_v40 = vpack.c.bf16 %v282_v39, %v281_v37 }
   0x9   :  { %456 = vmatprep.subr.bf16.mxu1 %v479_v10 }
   0xb   :  { %446 = vmatpush3.bf16.msra.mxu0 %v445_v14  ;;  %458 = vmatpush3.bf16.msra.mxu1 %v457_v31 }
   0xc   :  { %447 = vmatprep.subr.bf16.mxu0 %v479_v10  ;;  %459 = vmatprep.subr.bf16.mxu1 %v479_v10 }
   0xf   :  { %449 = vmatpush3.bf16.msra.mxu0 %v448_v18 }
  0x10   :  { %450 = vmatprep.subr.bf16.mxu0 %v479_v10 }
  0x13   :  { %452 = vmatpush3.bf16.msra.mxu0 %v451_v21 }
  0x87   :  { %v29_v24 = vpop.permute.xlu0 %28 }
  0x88   :  { %vm30_vm6 = vcmp.eq.s32.totalorder %v26_v23, %v29_v24 }
  0x89   :  { %v366_v25 = vsel %vm30_vm6, 1.0, %v477_v3 }
  0x8a   :  { %417 = vmatmul.mubr.msk.f32.vlgmr.msra.gmra.mrb[0].mxu0 %vm120_vm5, %v366_v25 }
 0x15d   :  { %v190_v32 = vpop.f32.mrb[0].mxu0 }
 0x15e   :  { %472 = vtanh.f32 %v190_v32  ;;  %v418_v33 = vpop.f32.mrb[1].mxu0 }
 0x168   :  { %v473_v34 = vpop.eup %472 }
 0x169   :  { %428 = vmatmul.mubr.msk.f32.vlgmr.msra.gmra.mrb[0].mxu1 %vm204_vm7, %v473_v34 }
 0x16a   :  { %438 = vmatprep.mubr.msk.f32.mxu1 %vm478_vm2, %v477_v3  ;;  %461 = vmatpush3.bf16.msra.mxu1 %v460_v38 }
 0x16b   :  { %462 = vmatprep.subr.bf16.mxu1 %v479_v10 }
 0x16e   :  { %464 = vmatpush3.bf16.msra.mxu1 %v463_v40 }
 0x23c   :  { %v274_v42 = vpop.f32.mrb[0].mxu1 }
 0x23d   :  { %v275_v43 = vadd.f32 %v370_v41, %v274_v42  ;;  %v429_v44 = vpop.f32.mrb[1].mxu1 }
 0x23f   :  { %474 = vtanh.f32 %v275_v43 }
 0x249   :  { %v475_v45 = vpop.eup %474 }
 0x24a   :  { %439 = vmatmul.mubr.msk.f32.vlgmr.msra.gmra.mrb[2].mxu1 %vm204_vm7, %v475_v45 }
 0x31d   :  { %v357_v47 = vpop.f32.mrb[2].mxu1 }
 0x31e   :  { %v358_v48 = vadd.f32 %v372_v46, %v357_v47  ;;  %v440_v49 = vpop.f32.mrb[3].mxu1 }
 0x320   :  { %361 = vst.msk [vmem:[%s586_s4] sm:$0xff] %vm42_vm1, %v358_v48 }

</bundles_post_ra>
